<compile_context>
chip_gen: v7x
topology: tpu7x:2x2x1
jax: 0.10.0
libtpu: 0.0.40
codegen_flags: <defaults>
</compile_context>

<pallas_src>
import jax
import jax.numpy as jnp
from jax.experimental import pallas as pl
from jax.experimental.pallas import tpu as pltpu

# ---------------- small, shape-consistent configuration ----------------
B       = 2
C_IN    = 8               # in_conv_channels
L       = 32              # in_conv_dim (Conv1d length; lin_adapt contracts this axis)
LIN_CH  = 16              # lin_channels (row/token axis of the linear stack)
PROJ    = 16              # conv_proj_dim
IN_LIN  = 16              # in_lin_dim
LINEAR_DIMS = [32, 16, 16]
CAT     = PROJ + IN_LIN
D0, D1, D2 = LINEAR_DIMS
LN_EPS  = float(LINEAR_DIMS[-1])   # faithful to nn.LayerNorm(lin_channels, linear_dims[-1])
SQRT1_2 = 0.7071067811865476

ROWS   = B * LIN_CH        # 32 : batch folded into the row axis
K_CONV = B * C_IN          # 16 : block-diagonal conv contraction dim
K_AUG  = 32                # conv K augmented with the bias (ones) row and zero-padded for alignment

# packed bf16 weight-slab row offsets (all multiples of 16 so bf16 (16,128) sublane tiles stay aligned)
_PK_CONV = 0               # (ROWS,   K_AUG) block-diagonal fused conv weight + bias column
_PK_CZ   = _PK_CONV + ROWS # (L,      D2)    wla.T @ w_y : lin_adapt folded into the fused MLP
_PK_X    = _PK_CZ + L      # (IN_LIN, D2)    fused MLP weight acting on the x_lin half
_PK_ROWS = _PK_X + IN_LIN  # 80 rows total


def _erf(x):
    """Abramowitz–Stegun 7.1.26 erf (|error| <= 1.5e-7).

    Keeps the GELU exact (erf-based, matching torch default) while relying only on
    exp / mul / add / abs / where, which all have Mosaic TPU lowerings.
    """
    a1, a2, a3, a4, a5 = 0.254829592, -0.284496736, 1.421413741, -1.453152027, 1.061405429
    p = 0.3275911
    ax = jnp.abs(x)
    t = 1.0 / (1.0 + p * ax)
    poly = ((((a5 * t + a4) * t + a3) * t + a2) * t + a1) * t
    y = 1.0 - poly * jnp.exp(-ax * ax)
    return jnp.where(x < 0.0, -y, y)


def convlin_kernel(xc_ref, xl_ref, wpack_ref, bpack_ref, out_ref):
    f32, bf16 = jnp.float32, jnp.bfloat16

    xc = xc_ref[...]                               # (K_AUG, L)     bf16 [x_conv rows | ones | zeros]
    xl = xl_ref[...]                               # (ROWS, IN_LIN) f32  (kept f32 for the residual)

    # Static slices of the single packed bf16 weight slab (one DMA for every weight; slices are free).
    w_conv = wpack_ref[_PK_CONV:_PK_CONV + ROWS, :]      # (ROWS, K_AUG)  block-diag conv + bias column
    w_cz   = wpack_ref[_PK_CZ:_PK_CZ + L, 0:D2]          # (L, D2)        wla.T @ w_y (fused)
    w_x    = wpack_ref[_PK_X:_PK_X + IN_LIN, 0:D2]       # (IN_LIN, D2)   fused MLP, x_lin half

    b_z   = bpack_ref[0:1, :]                      # (1, D2)     f32  fused bias of lin_adapt + lin[0..2]
    gamma = bpack_ref[1:2, :]                      # (1, LIN_CH) f32
    beta  = bpack_ref[2:3, :]                      # (1, LIN_CH) f32

    # conv_block + conv_adapt for the whole batch, bias folded via the ones row: one MXU pass.
    xconv = jnp.dot(w_conv, xc, preferred_element_type=f32)                  # (ROWS, L) f32

    # lin_adapt + lin[0..2] fused; cat([y, x_lin]) split into two accumulating matmuls (no lane concat).
    z = (jnp.dot(xconv.astype(bf16), w_cz, preferred_element_type=f32)
         + jnp.dot(xl.astype(bf16), w_x, preferred_element_type=f32)
         + b_z)                                                              # (ROWS, D2) f32

    # exact (erf) GELU, matching torch.nn.functional.gelu default; f32 tail (v5e VPU/EUP have no bf16)
    z = 0.5 * z * (1.0 + _erf(z * SQRT1_2))
    # residual (f32 x_lin); dropout = identity in eval mode
    z = z + xl
    # LayerNorm over last dim, eps = LINEAR_DIMS[-1] (faithful to the ctor); two-pass (centered) variance
    mean = jnp.mean(z, axis=-1, keepdims=True)
    zc = z - mean
    var = jnp.mean(zc * zc, axis=-1, keepdims=True)
    z = zc * jax.lax.rsqrt(var + LN_EPS) * gamma + beta

    # single merged, lane-contiguous output slab: [x_conv | x]  (one wide store, one output DMA)
    # TODO(synk): if ROWS/L grow, relayout this slab to a >=128-lane-dense shape before storing.
    out_ref[...] = jnp.concatenate([xconv, z], axis=-1).astype(out_ref.dtype)


def convlin_block(x_conv, x_lin, params):
    (wcb, bcb, wca, bca, wla, bla, w0, b0, w1, b1, w2, b2, gamma, beta) = params
    f32, bf16 = jnp.float32, jnp.bfloat16

    # ---- algebraic fusions (once, in f32, in the wrapper) ----
    w_fused = wca @ wcb                                    # (LIN_CH, C_IN)  conv_block ∘ conv_adapt
    b_fused = wca @ bcb + bca                              # (LIN_CH,)
    w012 = w0.T @ w1.T @ w2.T                              # (CAT, D2)  bias-only MLP (no nonlinearity inside)
    b012 = (b0 @ w1.T + b1) @ w2.T + b2                    # (D2,)
    w_y, w_x = w012[:PROJ], w012[PROJ:]                    # split ⇒ no lane-axis concat in the kernel
    w_cz = wla.T @ w_y                                     # (L, D2)  lin_adapt folded into the MLP
    b_z = bla @ w_y + b012                                 # (D2,)

    # ---- batch fold (block-diagonal conv weight) + conv-bias fold (bias column <-> ones row) ----
    # TODO(synk): if B grows, replace the kron fold with the shared (LIN_CH, C_IN) weight applied to
    # x reshaped as (C_IN, B*L): keeps K = C_IN and makes N = B*L lane-dense for the MXU.
    w_conv_blk = jnp.kron(jnp.eye(B, dtype=f32), w_fused)                  # (ROWS, K_CONV)
    b_conv_col = jnp.tile(b_fused, B).reshape(ROWS, 1)                     # (ROWS, 1)
    w_conv_aug = jnp.zeros((ROWS, K_AUG), f32)
    w_conv_aug = w_conv_aug.at[:, :K_CONV].set(w_conv_blk)
    w_conv_aug = w_conv_aug.at[:, K_CONV:K_CONV + 1].set(b_conv_col)

    # ---- pack parameters into 2 operands: 1 bf16 matmul slab + 1 f32 row block (2 DMAs total) ----
    # (sub-blocks padded to K_AUG=32 lanes; harmless at 5 KiB — re-lay out wide-dim-last if dims grow)
    w_cz_pad = jnp.zeros((L, K_AUG), f32).at[:, :D2].set(w_cz)
    w_x_pad = jnp.zeros((IN_LIN, K_AUG), f32).at[:, :D2].set(w_x)
    w_pack = jnp.concatenate([w_conv_aug, w_cz_pad, w_x_pad], axis=0).astype(bf16)   # (80, 32) bf16
    b_pack = jnp.stack([b_z, gamma, beta], axis=0).astype(f32)                       # (3, D2)  f32

    # ---- activations: fold batch into rows; augment + pre-cast the MXU-only conv input to bf16 ----
    xc_rows = x_conv.reshape(K_CONV, L)
    xc_aug = jnp.concatenate(
        [xc_rows, jnp.ones((1, L), f32), jnp.zeros((K_AUG - K_CONV - 1, L), f32)], axis=0
    ).astype(bf16)                                                                    # (K_AUG, L) bf16
    xl_rows = x_lin.reshape(ROWS, IN_LIN)                                             # (ROWS, IN_LIN) f32

    # advisory cost estimate so XLA can overlap neighbours with this tiny custom call
    flops = (2 * ROWS * K_AUG * L + 2 * ROWS * L * D2 + 2 * ROWS * IN_LIN * D2 + 40 * ROWS * D2)
    bytes_accessed = (xc_aug.size * 2 + xl_rows.size * 4 + w_pack.size * 2
                      + b_pack.size * 4 + ROWS * (L + D2) * 4)
    cost = pl.CostEstimate(flops=flops, transcendentals=ROWS * D2, bytes_accessed=bytes_accessed)

    out = pl.pallas_call(
        convlin_kernel,
        out_shape=jax.ShapeDtypeStruct((ROWS, L + D2), f32),
        in_specs=[pl.BlockSpec(memory_space=pltpu.MemorySpace.VMEM)] * 4,
        out_specs=pl.BlockSpec(memory_space=pltpu.MemorySpace.VMEM),
        cost_estimate=cost,
    )(xc_aug, xl_rows, w_pack, b_pack)
    # TODO(synk): if this block is mapped over many samples/timesteps, add a leading "parallel" grid axis
    # (>=2) so v7x can shard across both TensorCores; at B=2 a grid would only add per-step overhead.

    xconv_flat = out[:, :L]
    x_flat = out[:, L:]
    return (xconv_flat.reshape(B, LIN_CH, L),
            x_flat.reshape(B, LIN_CH, D2))


def reference(x_conv, x_lin, params):
    """Pure-JAX f32 reference mirroring the PyTorch forward (unfused)."""
    wcb, bcb, wca, bca, wla, bla, w0, b0, w1, b1, w2, b2, gamma, beta = params
    h = jnp.einsum("oc,bcl->bol", wcb, x_conv) + bcb[None, :, None]
    xc = jnp.einsum("oc,bcl->bol", wca, h) + bca[None, :, None]
    y = xc @ wla.T + bla
    z = jnp.concatenate([y, x_lin], axis=-1)
    z = z @ w0.T + b0
    z = z @ w1.T + b1
    z = z @ w2.T + b2
    z = 0.5 * z * (1.0 + jax.lax.erf(z * SQRT1_2))
    z = z + x_lin
    mean = z.mean(-1, keepdims=True)
    var = ((z - mean) ** 2).mean(-1, keepdims=True)
    z = (z - mean) / jnp.sqrt(var + LN_EPS) * gamma + beta
    return xc, z


def init_params(key):
    ks = jax.random.split(key, 14)
    s = 0.1
    wcb = s * jax.random.normal(ks[0], (C_IN, C_IN), jnp.float32)
    bcb = s * jax.random.normal(ks[1], (C_IN,), jnp.float32)
    wca = s * jax.random.normal(ks[2], (LIN_CH, C_IN), jnp.float32)
    bca = s * jax.random.normal(ks[3], (LIN_CH,), jnp.float32)
    wla = s * jax.random.normal(ks[4], (PROJ, L), jnp.float32)
    bla = s * jax.random.normal(ks[5], (PROJ,), jnp.float32)
    w0 = s * jax.random.normal(ks[6], (D0, CAT), jnp.float32)
    b0 = s * jax.random.normal(ks[7], (D0,), jnp.float32)
    w1 = s * jax.random.normal(ks[8], (D1, D0), jnp.float32)
    b1 = s * jax.random.normal(ks[9], (D1,), jnp.float32)
    w2 = s * jax.random.normal(ks[10], (D2, D1), jnp.float32)
    b2 = s * jax.random.normal(ks[11], (D2,), jnp.float32)
    gamma = jnp.ones((LIN_CH,), jnp.float32) + s * jax.random.normal(ks[12], (LIN_CH,), jnp.float32)
    beta = s * jax.random.normal(ks[13], (LIN_CH,), jnp.float32)
    return (wcb, bcb, wca, bca, wla, bla, w0, b0, w1, b1, w2, b2, gamma, beta)


if __name__ == "__main__":
    key = jax.random.PRNGKey(0)
    kx, kl, kp = jax.random.split(key, 3)
    x_conv = jax.random.normal(kx, (B, C_IN, L), jnp.float32)
    x_lin = jax.random.normal(kl, (B, LIN_CH, IN_LIN), jnp.float32)
    params = init_params(kp)

    out_conv, out_lin = convlin_block(x_conv, x_lin, params)
    jax.block_until_ready((out_conv, out_lin))

    ref_conv, ref_lin = reference(x_conv, x_lin, params)
    assert out_conv.shape == (B, LIN_CH, L) and out_lin.shape == (B, LIN_CH, D2)
    # bf16 MXU operands (incl. the folded bias column) + fused-weight rounding order vs the pure-f32
    # torch-style reference => tolerance 5e-3 (observed error is a few 1e-4).
    assert jnp.allclose(out_conv, ref_conv, atol=5e-3, rtol=5e-3)
    assert jnp.allclose(out_lin, ref_lin, atol=5e-3, rtol=5e-3)

    print("KERNEL_OK")
</pallas_src>

<mosaic_0001>
module attributes {stable_mosaic.version = 11 : i64} {
  func.func @convlin_kernel(%arg0: memref<32x32xbf16, #tpu.memory_space<vmem>>, %arg1: memref<32x16xf32, #tpu.memory_space<vmem>>, %arg2: memref<80x32xbf16, #tpu.memory_space<vmem>>, %arg3: memref<3x16xf32, #tpu.memory_space<vmem>>, %arg4: memref<32x48xf32, #tpu.memory_space<vmem>>) attributes {dimension_semantics = [], scalar_prefetch = 0 : i64, scratch_operands = 0 : i64, tpu.core_type = #tpu.core_type<tc>} {
    %c0 = arith.constant 0 : index
    %c0_0 = arith.constant 0 : index
    %0 = vector.load %arg0[%c0, %c0_0] : memref<32x32xbf16, #tpu.memory_space<vmem>>, vector<32x32xbf16>
    %c0_1 = arith.constant 0 : index
    %c0_2 = arith.constant 0 : index
    %1 = vector.load %arg1[%c0_1, %c0_2] : memref<32x16xf32, #tpu.memory_space<vmem>>, vector<32x16xf32>
    %c0_3 = arith.constant 0 : index
    %c0_4 = arith.constant 0 : index
    %2 = vector.load %arg2[%c0_3, %c0_4] : memref<80x32xbf16, #tpu.memory_space<vmem>>, vector<32x32xbf16>
    %c32 = arith.constant 32 : index
    %c0_5 = arith.constant 0 : index
    %3 = vector.load %arg2[%c32, %c0_5] : memref<80x32xbf16, #tpu.memory_space<vmem>>, vector<32x16xbf16>
    %c64 = arith.constant 64 : index
    %c0_6 = arith.constant 0 : index
    %4 = vector.load %arg2[%c64, %c0_6] : memref<80x32xbf16, #tpu.memory_space<vmem>>, vector<16x16xbf16>
    %c0_7 = arith.constant 0 : index
    %c0_8 = arith.constant 0 : index
    %5 = vector.load %arg3[%c0_7, %c0_8] : memref<3x16xf32, #tpu.memory_space<vmem>>, vector<1x16xf32>
    %c1 = arith.constant 1 : index
    %c0_9 = arith.constant 0 : index
    %6 = vector.load %arg3[%c1, %c0_9] : memref<3x16xf32, #tpu.memory_space<vmem>>, vector<1x16xf32>
    %c2 = arith.constant 2 : index
    %c0_10 = arith.constant 0 : index
    %7 = vector.load %arg3[%c2, %c0_10] : memref<3x16xf32, #tpu.memory_space<vmem>>, vector<1x16xf32>
    %cst = arith.constant dense<0.000000e+00> : vector<32x32xf32>
    %8 = tpu.matmul %2, %0, %cst {dimension_numbers = #tpu.dot_dimension_numbers<[1], [0], [0], [1], [0, 0, 1, 1], [], []>} : vector<32x32xbf16>, vector<32x32xbf16>, vector<32x32xf32> -> vector<32x32xf32>
    %9 = arith.truncf %8 : vector<32x32xf32> to vector<32x32xbf16>
    %cst_11 = arith.constant dense<0.000000e+00> : vector<32x16xf32>
    %10 = tpu.matmul %9, %3, %cst_11 {dimension_numbers = #tpu.dot_dimension_numbers<[1], [0], [0], [1], [0, 0, 1, 1], [], []>} : vector<32x32xbf16>, vector<32x16xbf16>, vector<32x16xf32> -> vector<32x16xf32>
    %11 = arith.truncf %1 : vector<32x16xf32> to vector<32x16xbf16>
    %cst_12 = arith.constant dense<0.000000e+00> : vector<32x16xf32>
    %12 = tpu.matmul %11, %4, %cst_12 {dimension_numbers = #tpu.dot_dimension_numbers<[1], [0], [0], [1], [0, 0, 1, 1], [], []>} : vector<32x16xbf16>, vector<16x16xbf16>, vector<32x16xf32> -> vector<32x16xf32>
    %13 = arith.addf %10, %12 : vector<32x16xf32>
    %14 = vector.broadcast %5 : vector<1x16xf32> to vector<32x16xf32>
    %15 = arith.addf %13, %14 : vector<32x16xf32>
    %cst_13 = arith.constant 5.000000e-01 : f32
    %16 = vector.broadcast %cst_13 : f32 to vector<32x16xf32>
    %17 = arith.mulf %16, %15 : vector<32x16xf32>
    %cst_14 = arith.constant 0.707106769 : f32
    %18 = vector.broadcast %cst_14 : f32 to vector<32x16xf32>
    %19 = arith.mulf %15, %18 : vector<32x16xf32>
    %20 = math.absf %19 : vector<32x16xf32>
    %cst_15 = arith.constant 0.327591091 : f32
    %21 = vector.broadcast %cst_15 : f32 to vector<32x16xf32>
    %22 = arith.mulf %21, %20 : vector<32x16xf32>
    %cst_16 = arith.constant 1.000000e+00 : f32
    %23 = vector.broadcast %cst_16 : f32 to vector<32x16xf32>
    %24 = arith.addf %23, %22 : vector<32x16xf32>
    %cst_17 = arith.constant 1.000000e+00 : f32
    %25 = vector.broadcast %cst_17 : f32 to vector<32x16xf32>
    %26 = arith.divf %25, %24 : vector<32x16xf32>
    %cst_18 = arith.constant 1.06140542 : f32
    %27 = vector.broadcast %cst_18 : f32 to vector<32x16xf32>
    %28 = arith.mulf %27, %26 : vector<32x16xf32>
    %cst_19 = arith.constant -1.45315206 : f32
    %29 = vector.broadcast %cst_19 : f32 to vector<32x16xf32>
    %30 = arith.addf %28, %29 : vector<32x16xf32>
    %31 = arith.mulf %30, %26 : vector<32x16xf32>
    %cst_20 = arith.constant 1.42141378 : f32
    %32 = vector.broadcast %cst_20 : f32 to vector<32x16xf32>
    %33 = arith.addf %31, %32 : vector<32x16xf32>
    %34 = arith.mulf %33, %26 : vector<32x16xf32>
    %cst_21 = arith.constant -0.284496725 : f32
    %35 = vector.broadcast %cst_21 : f32 to vector<32x16xf32>
    %36 = arith.addf %34, %35 : vector<32x16xf32>
    %37 = arith.mulf %36, %26 : vector<32x16xf32>
    %cst_22 = arith.constant 0.254829586 : f32
    %38 = vector.broadcast %cst_22 : f32 to vector<32x16xf32>
    %39 = arith.addf %37, %38 : vector<32x16xf32>
    %40 = arith.mulf %39, %26 : vector<32x16xf32>
    %cst_23 = arith.constant 0.000000e+00 : f32
    %41 = vector.broadcast %cst_23 : f32 to vector<32x16xf32>
    %42 = arith.subf %41, %20 : vector<32x16xf32>
    %43 = arith.mulf %42, %20 : vector<32x16xf32>
    %44 = math.exp %43 : vector<32x16xf32>
    %45 = arith.mulf %40, %44 : vector<32x16xf32>
    %cst_24 = arith.constant 1.000000e+00 : f32
    %46 = vector.broadcast %cst_24 : f32 to vector<32x16xf32>
    %47 = arith.subf %46, %45 : vector<32x16xf32>
    %cst_25 = arith.constant 0.000000e+00 : f32
    %48 = vector.broadcast %cst_25 : f32 to vector<32x16xf32>
    %49 = arith.cmpf olt, %19, %48 : vector<32x16xf32>
    %cst_26 = arith.constant 0.000000e+00 : f32
    %50 = vector.broadcast %cst_26 : f32 to vector<32x16xf32>
    %51 = arith.subf %50, %47 : vector<32x16xf32>
    %52 = arith.select %49, %51, %47 : vector<32x16xi1>, vector<32x16xf32>
    %cst_27 = arith.constant 1.000000e+00 : f32
    %53 = vector.broadcast %cst_27 : f32 to vector<32x16xf32>
    %54 = arith.addf %53, %52 : vector<32x16xf32>
    %55 = arith.mulf %17, %54 : vector<32x16xf32>
    %56 = arith.addf %55, %1 : vector<32x16xf32>
    %cst_28 = arith.constant dense<0.000000e+00> : vector<32xf32>
    %57 = vector.multi_reduction <add>, %56, %cst_28 [1] : vector<32x16xf32> to vector<32xf32>
    %58 = vector.shape_cast %57 : vector<32xf32> to vector<32x1xf32>
    %cst_29 = arith.constant 1.600000e+01 : f32
    %59 = vector.broadcast %cst_29 : f32 to vector<32x1xf32>
    %60 = arith.divf %58, %59 : vector<32x1xf32>
    %61 = vector.broadcast %60 : vector<32x1xf32> to vector<32x16xf32>
    %62 = arith.subf %56, %61 : vector<32x16xf32>
    %63 = arith.mulf %62, %62 : vector<32x16xf32>
    %cst_30 = arith.constant dense<0.000000e+00> : vector<32xf32>
    %64 = vector.multi_reduction <add>, %63, %cst_30 [1] : vector<32x16xf32> to vector<32xf32>
    %65 = vector.shape_cast %64 : vector<32xf32> to vector<32x1xf32>
    %cst_31 = arith.constant 1.600000e+01 : f32
    %66 = vector.broadcast %cst_31 : f32 to vector<32x1xf32>
    %67 = arith.divf %65, %66 : vector<32x1xf32>
    %cst_32 = arith.constant 1.600000e+01 : f32
    %68 = vector.broadcast %cst_32 : f32 to vector<32x1xf32>
    %69 = arith.addf %67, %68 : vector<32x1xf32>
    %70 = math.rsqrt %69 : vector<32x1xf32>
    %71 = vector.broadcast %70 : vector<32x1xf32> to vector<32x16xf32>
    %72 = arith.mulf %62, %71 : vector<32x16xf32>
    %73 = vector.broadcast %6 : vector<1x16xf32> to vector<32x16xf32>
    %74 = arith.mulf %72, %73 : vector<32x16xf32>
    %75 = vector.broadcast %7 : vector<1x16xf32> to vector<32x16xf32>
    %76 = arith.addf %74, %75 : vector<32x16xf32>
    %77 = tpu.concatenate %8, %76 in 1 : vector<32x32xf32>, vector<32x16xf32> -> vector<32x48xf32>
    %c0_33 = arith.constant 0 : index
    %c0_34 = arith.constant 0 : index
    %78 = vector.load %arg4[%c0_33, %c0_34] : memref<32x48xf32, #tpu.memory_space<vmem>>, vector<32x48xf32>
    tpu.vector_store %arg4[%c0_33, %c0_34], %77 {strides = array<i32>} : memref<32x48xf32, #tpu.memory_space<vmem>>, vector<32x48xf32>,
    return
  }
}

</mosaic_0001>

<bundles_post_ra>
// kernel: tpu_custom_call.1
= control target key start
LH: loop header
LB: loop body
LE: loop exit
PB: predicated region body
PF: predicated region fallthrough
CT: control target
= control target key end

     0   :  { %vm62_vm0 = vcmask 261120   ;;  %vm128_vm1 = vcmask 130048   ;;  %s758_s0 = inlined_call_operand.vmem [shape: bf16[32,32], index: 0, kind: input, shape index: {}]   ;;  %s759_s1 = inlined_call_operand.vmem [shape: f32[32,16], index: 1, kind: input, shape index: {}]   ;;  %s760_s2 = inlined_call_operand.vmem [shape: bf16[80,32], index: 2, kind: input, shape index: {}]   ;;  %s761_s3 = inlined_call_operand.vmem [shape: f32[3,16], index: 3, kind: input, shape index: {}]   ;;  %s762_s4 = inlined_call_operand.hbm [shape: f32[32,48], index: 4, kind: output, shape index: {}]  }
   0x1   :  { %v538_v0 = vld [vmem:[%s758_s0] sm:$0xff]   ;;  %v539_v1 = vld [vmem:[%s758_s0 + $0x8] sm:$0xff]   ;;  %v543_v8 = vld [vmem:[%s760_s2 + $0x10] sm:$0xff]  }
   0x2   :  { %508 = vmatprep.subr.bf16.mxu0 %v538_v0  ;;  %v540_v2 = vld [vmem:[%s760_s2] sm:$0xff]   ;;  %v541_v3 = vld [vmem:[%s760_s2 + $0x8] sm:$0xff]   ;;  %v656_v9 = vld [vmem:[%s759_s1 + $0x10] sm:$0xff] }
   0x3   :  { %509 = vmatpush3.bf16.msra.mxu0 %v538_v0  ;;  %512 = vmatprep.mubr.msk.bf16.mxu0 %vm62_vm0, %v540_v2  ;;  %v542_v4 = vld [vmem:[%s760_s2 + $0x20] sm:$0xff]   ;;  %v646_v6 = vld [vmem:[%s759_s1 + $0x8] sm:$0xff]  ;;  %v661_v10 = vld [vmem:[%s759_s1 + $0x18] sm:$0xff] }
   0x4   :  { %510 = vmatprep.subr.bf16.mxu0 %v539_v1  ;;  %v641_v5 = vld [vmem:[%s759_s1] sm:$0xff]  ;;  %516 = vmatprep.subr.bf16.mxu1 %v542_v4  ;;  %v121_v11 = vpack.c.bf16 %v661_v10, %v656_v9 }
   0x5   :  { %v120_v7 = vpack.c.bf16 %v646_v6, %v641_v5  ;;  %517 = vmatpush3.bf16.msra.mxu1 %v542_v4 }
   0x6   :  { %522 = vmatprep.subr.bf16.mxu1 %v543_v8 }
   0x7   :  { %511 = vmatpush3.bf16.msra.mxu0 %v539_v1  ;;  %518 = vmatprep.mubr.msk.bf16.mxu1 %vm128_vm1, %v120_v7 }
   0x8   :  { %9 = vsyncpa [#allocation3], 0  ;;  %519 = vmatmul.mubr.msk.bf16.vlgmr.msra.gmra.mrb[0].mxu1 %vm128_vm1, %v121_v11  ;;  %v544_v12 = vld [vmem:[%s760_s2 + $0x18] sm:$0xff]   ;;  %v494_v19 = vld [vmem:[%s761_s3] ss:$0 sm:$0xff]  ;;  %s593_s14 = smov 32  }
   0x9   :  { %523 = vmatpush3.bf16.msra.mxu1 %v543_v8  ;;  %vm460_vm6 = vcmask 392192  }
   0xa   :  { %513 = vmatmul.mubr.msk.bf16.vlgmr.msra.gmra.mrb[0].mxu0 %vm62_vm0, %v541_v3  ;;  %524 = vmatprep.subr.bf16.mxu1 %v544_v12 }
   0xd   :  { %525 = vmatpush3.bf16.msra.mxu1 %v544_v12 }
  0xdd   :  { %v671_v13 = vpop.f32.mrb[0].mxu0 }
  0xde   :  { %v673_v14 = vpop.f32.mrb[1].mxu0 }
  0xdf   :  { %v675_v15 = vpop.f32.mrb[2].mxu0 }
  0xe0   :  { %v119_v16 = vpack.c.bf16 %v675_v15, %v671_v13  ;;  %v679_v17 = vpop.f32.mrb[3].mxu0 }
  0xe1   :  { %v118_v18 = vpack.c.bf16 %v679_v17, %v673_v14 }
  0xe3   :  { %526 = vmatprep.mubr.msk.bf16.mxu1 %vm62_vm0, %v118_v18 }
  0xe4   :  { %527 = vmatmul.mubr.msk.bf16.vlgmr.msra.gmra.mrb[0].mxu1 %vm62_vm0, %v119_v16 }
 0x1b7   :  { %v528_v20 = vpop.f32.mrb[0].mxu1 }
 0x1b8   :  { %v688_v21 = vadd.f32 %v528_v20, %v494_v19  ;;  %v236_v22 = vpop.f32.mrb[1].mxu1 }
 0x1b9   :  { %v690_v23 = vadd.f32 %v494_v19, %v236_v22  ;;  %v529_v24 = vpop.f32.mrb[2].mxu1 }
 0x1ba   :  { %v693_v25 = vmul.f32 0.70710677, %v688_v21  ;;  %v695_v26 = vadd.f32 %v529_v24, %v494_v19  ;;  %v239_v27 = vpop.f32.mrb[3].mxu1 }
 0x1bb   :  { %v698_v28 = vmul.f32 0.70710677, %v690_v23  ;;  %v700_v29 = vadd.f32 %v494_v19, %v239_v27 }
 0x1bc   :  { %v269_v30 = vand.u32 2147483647, %v693_v25  ;;  %v704_v31 = vmul.f32 0.70710677, %v695_v26  ;;  %vm349_vm2 = vcmp.lt.f32.partialorder %v693_v25, 0.0 }
 0x1bd   :  { %v267_v32 = vand.u32 2147483647, %v698_v28  ;;  %v708_v33 = vmul.f32 0.70710677, %v700_v29  ;;  %vm347_vm3 = vcmp.lt.f32.partialorder %v698_v28, 0.0  ;;  %v262_v28 = vmul.f32 0.5, %v695_v26 }
 0x1be   :  { %v273_v34 = vmul.f32 0.3275911, %v269_v30  ;;  %v270_v35 = vand.u32 2147483647, %v704_v31  ;;  %v325_v44 = vsub.f32 0.0, %v269_v30  ;;  %vm350_vm4 = vcmp.lt.f32.partialorder %v704_v31, 0.0 }
 0x1bf   :  { %v271_v36 = vmul.f32 0.3275911, %v267_v32  ;;  %v268_v37 = vand.u32 2147483647, %v708_v33  ;;  %v323_v45 = vsub.f32 0.0, %v267_v32  ;;  %vm348_vm5 = vcmp.lt.f32.partialorder %v708_v33, 0.0 }
 0x1c0   :  { %v277_v38 = vadd.f32 1.0, %v273_v34  ;;  %v274_v39 = vmul.f32 0.3275911, %v270_v35  ;;  %v329_v47 = vmul.f32 %v325_v44, %v269_v30  ;;  %v326_v48 = vsub.f32 0.0, %v270_v35 }
 0x1c1   :  { %v275_v40 = vadd.f32 1.0, %v271_v36  ;;  %v272_v41 = vmul.f32 0.3275911, %v268_v37  ;;  %v327_v50 = vmul.f32 %v323_v45, %v267_v32  ;;  %v324_v52 = vsub.f32 0.0, %v268_v37 }
 0x1c2   :  { %545 = vrcp.f32 %v277_v38  ;;  %v278_v42 = vadd.f32 1.0, %v274_v39  ;;  %v335_v56 = vmul.f32 1.442695, %v329_v47  ;;  %v330_v57 = vmul.f32 %v326_v48, %v270_v35 }
 0x1c3   :  { %547 = vrcp.f32 %v275_v40  ;;  %v276_v43 = vadd.f32 1.0, %v272_v41  ;;  %v331_v59 = vmul.f32 1.442695, %v327_v50  ;;  %v328_v63 = vmul.f32 %v324_v52, %v268_v37 }
 0x1c4   :  { %549 = vrcp.f32 %v278_v42  ;;  %v337_v4 = vmul.f32 1.442695, %v330_v57 }
 0x1c5   :  { %551 = vrcp.f32 %v276_v43  ;;  %v333_v16 = vmul.f32 1.442695, %v328_v63 }
 0x1c6   :  { %553 = vpow2.f32 %v335_v56 }
 0x1c7   :  { %555 = vpow2.f32 %v331_v59 }
 0x1c8   :  { %557 = vpow2.f32 %v337_v4 }
 0x1c9   :  { %559 = vpow2.f32 %v333_v16 }
 0x1cc   :  { %v546_v46 = vpop.eup %545 }
 0x1cd   :  { %v548_v49 = vpop.eup %547  ;;  %v289_v51 = vmul.f32 1.0614054, %v546_v46 }
 0x1ce   :  { %v287_v53 = vmul.f32 1.0614054, %v548_v49  ;;  %v550_v55 = vpop.eup %549 }
 0x1cf   :  { %v293_v54 = vadd.f32 -1.4531521, %v289_v51  ;;  %v290_v61 = vmul.f32 1.0614054, %v550_v55  ;;  %v552_v62 = vpop.eup %551 }
 0x1d0   :  { %v291_v58 = vadd.f32 -1.4531521, %v287_v53  ;;  %v288_v3 = vmul.f32 1.0614054, %v552_v62  ;;  %v554_v42 = vpop.eup %553 }
 0x1d1   :  { %v297_v60 = vmul.f32 %v546_v46, %v293_v54  ;;  %v294_v2 = vadd.f32 -1.4531521, %v290_v61  ;;  %v556_v44 = vpop.eup %555 }
 0x1d2   :  { %v295_v0 = vmul.f32 %v548_v49, %v291_v58  ;;  %v292_v12 = vadd.f32 -1.4531521, %v288_v3  ;;  %v558_v54 = vpop.eup %557 }
 0x1d3   :  { %v301_v1 = vadd.f32 1.4214138, %v297_v60  ;;  %v298_v11 = vmul.f32 %v550_v55, %v294_v2  ;;  %v560_v60 = vpop.eup %559 }
 0x1d4   :  { %v299_v7 = vadd.f32 1.4214138, %v295_v0  ;;  %v296_v22 = vmul.f32 %v552_v62, %v292_v12  ;;  %v261_v0 = vmul.f32 0.5, %v688_v21 }
 0x1d5   :  { %v305_v8 = vmul.f32 %v546_v46, %v301_v1  ;;  %v302_v20 = vadd.f32 1.4214138, %v298_v11 }
 0x1d6   :  { %v303_v18 = vmul.f32 %v548_v49, %v299_v7  ;;  %v300_v32 = vadd.f32 1.4214138, %v296_v22 }
 0x1d7   :  { %v309_v19 = vadd.f32 -0.28449672, %v305_v8  ;;  %v306_v30 = vmul.f32 %v550_v55, %v302_v20 }
 0x1d8   :  { %v307_v24 = vadd.f32 -0.28449672, %v303_v18  ;;  %v304_v37 = vmul.f32 %v552_v62, %v300_v32 }
 0x1d9   :  { %v313_v27 = vmul.f32 %v546_v46, %v309_v19  ;;  %v310_v36 = vadd.f32 -0.28449672, %v306_v30 }
 0x1da   :  { %v311_v34 = vmul.f32 %v548_v49, %v307_v24  ;;  %v308_v41 = vadd.f32 -0.28449672, %v304_v37 }
 0x1db   :  { %v317_v35 = vadd.f32 0.2548296, %v313_v27  ;;  %v314_v40 = vmul.f32 %v550_v55, %v310_v36 }
 0x1dc   :  { %v315_v38 = vadd.f32 0.2548296, %v311_v34  ;;  %v312_v48 = vmul.f32 %v552_v62, %v308_v41 }
 0x1dd   :  { %v321_v39 = vmul.f32 %v546_v46, %v317_v35  ;;  %v318_v47 = vadd.f32 0.2548296, %v314_v40 }
 0x1de   :  { %v319_v43 = vmul.f32 %v548_v49, %v315_v38  ;;  %v316_v53 = vadd.f32 0.2548296, %v312_v48 }
 0x1df   :  { %v341_v45 = vmul.f32 %v554_v42, %v321_v39  ;;  %v322_v52 = vmul.f32 %v550_v55, %v318_v47  ;;  %v259_v55 = vmul.f32 0.5, %v690_v23  ;;  %v260_v23 = vmul.f32 0.5, %v700_v29 }
 0x1e0   :  { %v339_v50 = vmul.f32 %v556_v44, %v319_v43  ;;  %v320_v59 = vmul.f32 %v552_v62, %v316_v53 }
 0x1e1   :  { %v345_v51 = vsub.f32 1.0, %v341_v45  ;;  %v342_v58 = vmul.f32 %v558_v54, %v322_v52 }
 0x1e2   :  { %v343_v56 = vsub.f32 1.0, %v339_v50  ;;  %v340_v63 = vmul.f32 %v560_v60, %v320_v59 }
 0x1e3   :  { %v353_v57 = vsub.f32 0.0, %v345_v51  ;;  %v346_v61 = vsub.f32 1.0, %v342_v58 }
 0x1e4   :  { %v351_v46 = vsub.f32 0.0, %v343_v56  ;;  %v344_v7 = vsub.f32 1.0, %v340_v63  ;;  %v495_v63 = vld [vmem:[%s761_s3 + $0x1] ss:$0 sm:$0xff] }
 0x1e5   :  { %v357_v49 = vsel %vm349_vm2, %v353_v57, %v345_v51  ;;  %v354_v4 = vsub.f32 0.0, %v346_v61 }
 0x1e6   :  { %v361_v1 = vadd.f32 1.0, %v357_v49  ;;  %v355_v2 = vsel %vm347_vm3, %v351_v46, %v343_v56  ;;  %v352_v11 = vsub.f32 0.0, %v344_v7 }
 0x1e7   :  { %v359_v3 = vadd.f32 1.0, %v355_v2  ;;  %v358_v25 = vsel %vm350_vm4, %v354_v4, %v346_v61 }
 0x1e8   :  { %v365_v62 = vmul.f32 %v361_v1, %v261_v0  ;;  %v362_v21 = vadd.f32 1.0, %v358_v25  ;;  %v356_v18 = vsel %vm348_vm5, %v352_v11, %v344_v7  ;;  %v496_v1 = vld [vmem:[%s761_s3 + $0x2] ss:$0 sm:$0xff]  ;;  %s594_s3 = smov [#allocation2]  }
 0x1e9   :  { %v363_v8 = vmul.f32 %v359_v3, %v259_v55  ;;  %v360_v31 = vadd.f32 1.0, %v356_v18  ;;  %s470_s15 = sshll.u32 %s594_s3, 4  ;;  %s471_s15 = int_to_ptr.vmem [resolvable:$true] %s470_s15 }
 0x1ea   :  { %v369_v12 = vadd.f32 %v365_v62, %v656_v9  ;;  %v366_v20 = vmul.f32 %v362_v21, %v262_v28  ;;  %s569_s16 = scalar_lea.vmem %s471_s15, 512  ;;  %p574_p1 = scmp.lt.s32.totalorder %s471_s15, %s471_s15 }
 0x1eb   :  { %v367_v16 = vadd.f32 %v363_v8, %v641_v5  ;;  %v364_v24 = vmul.f32 %v360_v31, %v260_v23  ;;  %p570_p0 = scmp.ne.s32.totalorder %s471_s15, %s569_s16  ;;  %p575_p2 = scmp.lt.s32.totalorder %s569_s16, %s569_s16 }
 0x1ec   :  { %v377_v19 = vsel %vm128_vm1, %v369_v12, 0.0  ;;  %v370_v26 = vadd.f32 %v366_v20, %v661_v10 }
 0x1ed   :  { %378 = vadd.xlane.f32.xlu1 %v377_v19  ;;  %v371_v22 = vsel %vm128_vm1, %v367_v16, 0.0  ;;  %v368_v9 = vadd.f32 %v364_v24, %v646_v6  ;;  %p576_p3 = por %p575_p2, %p574_p1 }
 0x1ee   :  { %372 = vadd.xlane.f32.xlu0 %v371_v22  ;;  %v380_v33 = vsel %vm128_vm1, %v370_v26, 0.0 }
 0x1ef   :  { %v374_v5 = vsel %vm128_vm1, %v368_v9, 0.0  ;;  %p577_p4 = pnand %p576_p3, %p570_p0 }
 0x1f1   :  { %381 = vadd.xlane.f32.xlu1 %v380_v33 }
 0x1f2   :  { %375 = vadd.xlane.f32.xlu0 %v374_v5 }
 0x27a   :  { %v379_v29 = vpop.xlane.xlu1 %378 }
 0x27b   :  { %v386_v27 = vmul.f32 0.0625, %v379_v29  ;;  %v373_v30 = vpop.xlane.xlu0 %372 }
 0x27c   :  { %v384_v32 = vmul.f32 0.0625, %v373_v30 }
 0x27d   :  { %v390_v34 = vsub.f32 %v369_v12, %v386_v27 }
 0x27e   :  { %v388_v35 = vsub.f32 %v367_v16, %v384_v32  ;;  %v382_v36 = vpop.xlane.xlu1 %381 }
 0x27f   :  { %v387_v37 = vmul.f32 0.0625, %v382_v36  ;;  %v376_v38 = vpop.xlane.xlu0 %375  ;;  %v394_v41 = vmul.f32 %v390_v34, %v390_v34 }
 0x280   :  { %v392_v39 = vmul.f32 %v388_v35, %v388_v35  ;;  %v385_v10 = vmul.f32 0.0625, %v376_v38 }
 0x281   :  { %v391_v42 = vsub.f32 %v370_v26, %v387_v37  ;;  %v402_v44 = vsel %vm128_vm1, %v394_v41, 0.0 }
 0x282   :  { %v396_v40 = vsel %vm128_vm1, %v392_v39, 0.0  ;;  %v389_v6 = vsub.f32 %v368_v9, %v385_v10 }
 0x283   :  { %397 = vadd.xlane.f32.xlu0 %v396_v40  ;;  %v395_v47 = vmul.f32 %v391_v42, %v391_v42 }
 0x284   :  { %v393_v43 = vmul.f32 %v389_v6, %v389_v6 }
 0x285   :  { %v405_v48 = vsel %vm128_vm1, %v395_v47, 0.0 }
 0x286   :  { %v399_v45 = vsel %vm128_vm1, %v393_v43, 0.0 }
 0x287   :  { %403 = vadd.xlane.f32.xlu0 %v402_v44  ;;  %400 = vadd.xlane.f32.xlu1 %v399_v45 }
 0x28b   :  { %406 = vadd.xlane.f32.xlu1 %v405_v48 }
 0x310   :  { %v398_v50 = vpop.xlane.xlu0 %397 }
 0x311   :  { %v408_v51 = vmul.f32 0.0625, %v398_v50 }
 0x313   :  { %v412_v52 = vadd.f32 16.0, %v408_v51 }
 0x314   :  { %v404_v53 = vpop.xlane.xlu0 %403  ;;  %v401_v54 = vpop.xlane.xlu1 %400 }
 0x315   :  { %561 = vrsqrt.f32 %v412_v52  ;;  %v410_v56 = vmul.f32 0.0625, %v404_v53  ;;  %v409_v57 = vmul.f32 0.0625, %v401_v54 }
 0x317   :  { %v414_v58 = vadd.f32 16.0, %v410_v56  ;;  %v413_v59 = vadd.f32 16.0, %v409_v57 }
 0x318   :  { %v407_v60 = vpop.xlane.xlu1 %406 }
 0x319   :  { %563 = vrsqrt.f32 %v414_v58  ;;  %v411_v46 = vmul.f32 0.0625, %v407_v60 }
 0x31a   :  { %565 = vrsqrt.f32 %v413_v59 }
 0x31b   :  { %v415_v49 = vadd.f32 16.0, %v411_v46 }
 0x31d   :  { %567 = vrsqrt.f32 %v415_v49 }
 0x31f   :  { %v562_v61 = vpop.eup %561 }
 0x320   :  { %v420_v0 = vmul.f32 %v562_v61, %v388_v35 }
 0x322   :  { %v428_v2 = vmul.f32 %v495_v63, %v420_v0 }
 0x323   :  { %v564_v55 = vpop.eup %563 }
 0x324   :  { %v566_v3 = vpop.eup %565  ;;  %v436_v4 = vadd.f32 %v496_v1, %v428_v2  ;;  %v422_v7 = vmul.f32 %v564_v55, %v390_v34 }
 0x325   :  { %v421_v62 = vmul.f32 %v566_v3, %v389_v6 }
 0x326   :  { %444 = vrot.lane.b32.xlu0 %v436_v4, %s593_s14  ;;  %v430_v8 = vmul.f32 %v495_v63, %v422_v7 }
 0x327   :  { %v568_v25 = vpop.eup %567  ;;  %v429_v28 = vmul.f32 %v495_v63, %v421_v62 }
 0x328   :  { %v438_v11 = vadd.f32 %v496_v1, %v430_v8  ;;  %v423_v12 = vmul.f32 %v568_v25, %v391_v42 }
 0x329   :  { %v437_v21 = vadd.f32 %v496_v1, %v429_v28 }
 0x32a   :  { %448 = vrot.lane.b32.xlu1 %v438_v11, %s593_s14  ;;  %v431_v16 = vmul.f32 %v495_v63, %v423_v12 }
 0x32c   :  { %v439_v18 = vadd.f32 %v496_v1, %v431_v16 }
 0x32e   :  { %446 = vrot.lane.b32.xlu1 %v437_v21, %s593_s14 }
 0x332   :  { %450 = vrot.lane.b32.xlu1 %v439_v18, %s593_s14 }
 0x398   :  { %v445_v23 = vpop.permute.xlu0 %444 }
 0x399   :  { %v456_v19 = vsel %vm62_vm0, %v673_v14, %v445_v23 }
 0x39a   :  { %461 = vst.msk [vmem:[#allocation2] sm:$0xff] %vm460_vm6, %v456_v19 }
 0x39c   :  { %v449_v20 = vpop.permute.xlu1 %448 }
 0x39d   :  { %v458_v31 = vsel %vm62_vm0, %v671_v13, %v449_v20 }
 0x39e   :  { %463 = vst.msk [vmem:[#allocation2 + $0x10] sm:$0xff] %vm460_vm6, %v458_v31 }
 0x3a0   :  { %v447_v22 = vpop.permute.xlu1 %446 }
 0x3a1   :  { %v457_v26 = vsel %vm62_vm0, %v679_v17, %v447_v22 }
 0x3a2   :  { %462 = vst.msk [vmem:[#allocation2 + $0x8] sm:$0xff] %vm460_vm6, %v457_v26 }
 0x3a4   :  { %v451_v24 = vpop.permute.xlu1 %450 }
 0x3a5   :  { %v459_v33 = vsel %vm62_vm0, %v675_v15, %v451_v24 }
 0x3a6   :  { %464 = vst.msk [vmem:[#allocation2 + $0x18] sm:$0xff] %vm460_vm6, %v459_v33 }
 0x3a7   :  { %580 = shalt.err (!%p577_p4)
}
 0x3a8   :  { %s581_s19 = scalar_lea.hbm %s762_s4, 512 }
 0x3a9   :  { %p582_p5 = scmp.ne.s32.totalorder %s762_s4, %s581_s19  ;;  %p585_p6 = scmp.lt.u32.totalorder %s581_s19, %s762_s4 }
 0x3ab   :  { %p587_p7 = pnand %p585_p6, %p582_p5 }
 0x3ad   :  { %590 = shalt.err (!%p587_p7)
}
 0x3ae   :  { %s595_s24 = smov 128   ;;  %s596_s25 = smov 8  }
 0x3af   :  { %476 = dma.vmem_to_hbm [thread:$0]  %s471_s15, 512, %s762_s4, [#allocation3], %s595_s24, %s595_s24, %s596_s25  }
 0x3b0   :  { %591 = dma.done.wait [#allocation3], 512  }
 0x3b1   :  { %592 = vsyncadd [#allocation3], 4294966784 }
 0x3b2   :  { %480 = vsyncpa [#allocation3], 1 }

</bundles_post_ra>
